<compile_context>
chip_gen: v7x
topology: tpu7x:2x2x1
jax: 0.10.0
libtpu: 0.0.40
codegen_flags: <defaults>
</compile_context>

<pallas_src>
import numpy as np
import jax
import jax.numpy as jnp
from jax.experimental import pallas as pl
from jax.experimental.pallas import tpu as pltpu


def decoder_block_forward(x, w, b, gamma, beta, *, num_groups,
                          upsample_size=2, kernel_size=7, padding=3, eps=1e-5,
                          conv_dtype=jnp.bfloat16, out_dtype=jnp.float32):
    """Fused DecoderBlock.forward (norm_type='group_norm').

    x:     (N, C_in, L)      float32
    w:     (C_in, C_out, K)  ConvTranspose1d weight (PyTorch layout)
    b:     (C_out,)          ConvTranspose1d bias
    gamma: (C_out,)          GroupNorm weight
    beta:  (C_out,)          GroupNorm bias
    returns (N, C_out, 2*L)  out_dtype
    """
    N, C_in, L = x.shape
    _, C_out, K = w.shape
    assert K == kernel_size
    # TODO(synk): only the module-default fast path is implemented
    # (upsample_size=2, 'same' transposed conv with 2*padding == K-1, norm_type='group_norm').
    assert upsample_size == 2 and 2 * padding == K - 1 and C_out % num_groups == 0
    L_out = 2 * L
    G = num_groups
    cpg = C_out // G
    R = 2 * C_out                           # rows: [even-parity channels | odd-parity channels]

    # ---------------- parameter prep (tiny, done once) ----------------
    # ConvTranspose1d(stride=1) == same-conv with flipped/transposed kernel:
    #   wt[j, co, ci] = w[ci, co, K-1-j]
    # Nearest-x2 upsample => u[2t] == u[2t+1] == x[t]; taps reading the same original
    # column are pre-summed into per-parity "phase" weights, indexed by the input shift
    #   s = floor((r + j - padding)/2),  r in {0: even output cols, 1: odd output cols}.
    wt = jnp.transpose(w[:, :, ::-1], (2, 1, 0)).astype(jnp.float32)    # (K, C_out, C_in)
    shift = lambda r, j: (r + j - padding) // 2                         # python floor div
    shifts = sorted({shift(r, j) for r in (0, 1) for j in range(K)})
    D = len(shifts)
    halves = []
    for r in (0, 1):
        blocks = []
        for s in shifts:
            js = [j for j in range(K) if shift(r, j) == s]
            blk = sum((wt[j] for j in js), jnp.zeros((C_out, C_in), jnp.float32))
            blocks.append(blk)
        halves.append(jnp.concatenate(blocks, axis=1))                  # (C_out, D*C_in)
    w_stack = jnp.concatenate(halves, axis=0).astype(conv_dtype)        # (R, D*C_in)

    b2 = jnp.concatenate([b, b]).reshape(R, 1).astype(jnp.float32)
    g2 = jnp.concatenate([gamma, gamma]).reshape(R, 1).astype(jnp.float32)
    be2 = jnp.concatenate([beta, beta]).reshape(R, 1).astype(jnp.float32)

    # Group-mean operator (hoisted): gm[r, r'] = 1/(cpg*L_out) iff rows r, r' share a group.
    row_group = np.tile(np.repeat(np.arange(G), cpg), 2)                # (R,)
    gm = jnp.asarray((row_group[:, None] == row_group[None, :]).astype(np.float32)
                     / float(cpg * L_out))                              # (R, R)

    # ---- batch blocking: fold bn samples into the lane axis per grid step ----
    # Small total work -> one grid step (best on 1-TC v5e/v6e; avoids per-step overhead).
    # Large work -> >=2 parallel lane-dense steps (bn*L multiple of 128) for v7x's 2 TCs.
    max_lanes = 4096
    if N * L <= max_lanes:
        bn = N
    else:
        cands = [d for d in range(1, N + 1)
                 if N % d == 0 and d * L <= max_lanes and (d * L) % 128 == 0 and d <= 128]
        bn = max(cands) if cands else N
    nblk = N // bn
    lanes = bn * L

    # Sample segment-sum / broadcast matrices for the batched GroupNorm epilogue (hoisted).
    seg_np = np.kron(np.eye(bn, dtype=np.float32), np.ones((L, 1), np.float32))  # (bn*L, bn)
    seg = jnp.asarray(seg_np)
    segT = jnp.asarray(seg_np.T)                                        # (bn, bn*L)

    # Pre-padded input: in-kernel shifted views become direct static slices (no zero glue).
    pad_l = max(0, -shifts[0])
    pad_r = max(0, shifts[-1])
    Lp = L + pad_l + pad_r
    offsets = [s + pad_l for s in shifts]
    x_pad = jnp.pad(x, ((0, 0), (0, 0), (pad_l, pad_r))).astype(conv_dtype)      # (N, C_in, Lp)

    def kernel(x_ref, w_ref, b_ref, g_ref, be_ref, gm_ref, seg_ref, segT_ref, o_ref):
        xt = x_ref[...]                                                 # (bn, C_in, Lp) conv_dtype
        # Stacked shifted operand (D*C_in, bn*L): static slices of the pre-padded tile.
        x_stack = jnp.concatenate(
            [jnp.concatenate([xt[n, :, off:off + L] for n in range(bn)], axis=1)
             for off in offsets], axis=0)

        # Upsample + ConvTranspose1d for both output parities: ONE MXU matmul.
        acc = jnp.dot(w_ref[...], x_stack, preferred_element_type=jnp.float32)   # (R, bn*L)
        acc = jnp.maximum(acc + b_ref[...], 0.0)                        # bias + ReLU (f32)

        # ---- GroupNorm, batched over all bn samples (no per-sample python loop) ----
        s1 = jnp.dot(acc, seg_ref[...], preferred_element_type=jnp.float32)        # (R, bn)
        s2 = jnp.dot(acc * acc, seg_ref[...], preferred_element_type=jnp.float32)  # (R, bn)
        mean_r = jnp.dot(gm_ref[...], s1, preferred_element_type=jnp.float32)      # (R, bn)
        ex2_r = jnp.dot(gm_ref[...], s2, preferred_element_type=jnp.float32)       # (R, bn)
        # TODO(synk): one-pass E[x^2]-mean^2 variance (clamped); switch to a centered
        # two-pass if tighter-than-1e-2 agreement is ever required.
        var_r = jnp.maximum(ex2_r - mean_r * mean_r, 0.0)
        inv_r = jax.lax.rsqrt(var_r + eps)
        a_aff = g_ref[...] * inv_r                                      # folded affine:
        c_aff = be_ref[...] - mean_r * a_aff                            #   y = a*acc + c
        # Broadcast per-sample affine across each sample's L lanes (wide-N matmuls).
        a_full = jnp.dot(a_aff, segT_ref[...], preferred_element_type=jnp.float32)  # (R, bn*L)
        c_full = jnp.dot(c_aff, segT_ref[...], preferred_element_type=jnp.float32)
        # Single lane-dense slab store (phase-major; interleave handled by the wrapper).
        o_ref[...] = (acc * a_full + c_full).astype(o_ref.dtype)

    const2 = lambda i: (0, 0)
    cbytes = jnp.dtype(conv_dtype).itemsize
    est = (2 * bn * C_in * Lp * cbytes            # x tile (double-buffered)
           + 2 * R * lanes * 4                    # output tile (double-buffered)
           + 2 * 2 * lanes * bn * 4               # seg + segT
           + D * C_in * lanes * cbytes            # x_stack value
           + 6 * R * lanes * 4                    # acc / acc^2 / a_full / c_full / y
           + 4 * R * (D * C_in + R + 3) * 4)      # small constants
    vmem_limit = int(min(48 * 1024 * 1024, max(16 * 1024 * 1024, 2 * est)))

    out2d = pl.pallas_call(
        kernel,
        out_shape=jax.ShapeDtypeStruct((R, N * L), out_dtype),
        grid=(nblk,),
        in_specs=[
            pl.BlockSpec((bn, C_in, Lp), lambda i: (i, 0, 0)),          # pre-padded x
            pl.BlockSpec((R, D * C_in), const2),                        # stacked phase weights
            pl.BlockSpec((R, 1), const2),                               # bias   (even|odd tiled)
            pl.BlockSpec((R, 1), const2),                               # gamma
            pl.BlockSpec((R, 1), const2),                               # beta
            pl.BlockSpec((R, R), const2),                               # group-mean operator
            pl.BlockSpec((bn * L, bn), const2),                         # sample segment-sum
            pl.BlockSpec((bn, bn * L), const2),                         # sample broadcast
        ],
        out_specs=pl.BlockSpec((R, bn * L), lambda i: (0, i)),
        compiler_params=pltpu.CompilerParams(
            dimension_semantics=("parallel",),
            vmem_limit_bytes=vmem_limit,
        ),
    )(x_pad, w_stack, b2, g2, be2, gm, seg, segT)

    # Wrapper-side even/odd interleave: out2d[p*C_out + c, n*L + t] == y[n, c, 2*t + p].
    return (out2d.reshape(2, C_out, N, L)
                 .transpose(2, 1, 3, 0)
                 .reshape(N, C_out, L_out))


# ----------------------- pure-JAX reference (for checking) -----------------------
def _conv_transpose1d_ref(x, w, b, padding):
    """Direct definition of ConvTranspose1d, stride=1."""
    N, Cin, Lin = x.shape
    _, Cout, K = w.shape
    Lout = (Lin - 1) + K - 2 * padding
    out = jnp.zeros((N, Cout, Lout), jnp.float32)
    for j in range(K):
        contrib = jnp.einsum('ncl,cd->ndl', x, w[:, :, j],
                             precision=jax.lax.Precision.HIGHEST)
        lo = j - padding
        s_out, e_out = max(lo, 0), min(lo + Lin, Lout)
        s_in, e_in = s_out - lo, e_out - lo
        if s_out < e_out:
            out = out.at[:, :, s_out:e_out].add(contrib[:, :, s_in:e_in])
    return out + b[None, :, None]


def decoder_block_reference(x, w, b, gamma, beta, *, num_groups,
                            upsample_size=2, padding=3, eps=1e-5):
    x_up = jnp.repeat(x.astype(jnp.float32), upsample_size, axis=2)
    y = _conv_transpose1d_ref(x_up, w, b, padding)
    y = jnp.maximum(y, 0.0)
    N, C, L = y.shape
    yg = y.reshape(N, num_groups, (C // num_groups) * L)
    mean = yg.mean(axis=2, keepdims=True)
    var = ((yg - mean) ** 2).mean(axis=2, keepdims=True)
    yn = ((yg - mean) / jnp.sqrt(var + eps)).reshape(N, C, L)
    return yn * gamma[None, :, None] + beta[None, :, None]


if __name__ == "__main__":
    # Module config (norm_type='group_norm'): in_channels=8, out_channels=8,
    # num_encoders=2 (GroupNorm groups), kernel_size=7, stride=1, padding=3,
    # upsample_size=2, input_padding=0.
    N, C_in, C_out, L, K = 2, 8, 8, 16, 7
    num_encoders = 2

    key = jax.random.PRNGKey(0)
    kx, kw, kb, kg, kbe = jax.random.split(key, 5)
    x = jax.random.normal(kx, (N, C_in, L), dtype=jnp.float32)
    w = 0.2 * jax.random.normal(kw, (C_in, C_out, K), dtype=jnp.float32)    # ConvTranspose1d weight
    b = 0.1 * jax.random.normal(kb, (C_out,), dtype=jnp.float32)            # ConvTranspose1d bias
    gamma = 1.0 + 0.1 * jax.random.normal(kg, (C_out,), dtype=jnp.float32)  # GroupNorm weight
    beta = 0.1 * jax.random.normal(kbe, (C_out,), dtype=jnp.float32)        # GroupNorm bias

    ref = decoder_block_reference(x, w, b, gamma, beta, num_groups=num_encoders)

    # f32 MXU operands: tight check of the fused algorithm.
    out_f32 = jax.block_until_ready(
        decoder_block_forward(x, w, b, gamma, beta, num_groups=num_encoders,
                              conv_dtype=jnp.float32))
    np.testing.assert_allclose(np.asarray(out_f32), np.asarray(ref), rtol=2e-2, atol=2e-2)

    # Default bf16 MXU operands (f32 accumulate + f32 epilogue): looser check.
    out_bf16 = jax.block_until_ready(
        decoder_block_forward(x, w, b, gamma, beta, num_groups=num_encoders))
    np.testing.assert_allclose(np.asarray(out_bf16), np.asarray(ref), rtol=5e-2, atol=5e-2)

    print("KERNEL_OK")
</pallas_src>

<mosaic_0001>
module attributes {stable_mosaic.version = 11 : i64} {
  func.func @kernel(%arg0: i32, %arg1: memref<2x8x20xf32, #tpu.memory_space<vmem>>, %arg2: memref<16x40xf32, #tpu.memory_space<vmem>>, %arg3: memref<16x1xf32, #tpu.memory_space<vmem>>, %arg4: memref<16x1xf32, #tpu.memory_space<vmem>>, %arg5: memref<16x1xf32, #tpu.memory_space<vmem>>, %arg6: memref<16x16xf32, #tpu.memory_space<vmem>>, %arg7: memref<32x2xf32, #tpu.memory_space<vmem>>, %arg8: memref<2x32xf32, #tpu.memory_space<vmem>>, %arg9: memref<16x32xf32, #tpu.memory_space<vmem>>) attributes {dimension_semantics = [#tpu.dimension_semantics<parallel>], iteration_bounds = array<i64: 1>, scalar_prefetch = 0 : i64, scratch_operands = 0 : i64, tpu.core_type = #tpu.core_type<tc>, window_params = [{transform_indices = @transform_0, window_bounds = array<i64: 2, 8, 20>}, {pipeline_mode = #tpu.pipeline_mode<synchronous>, transform_indices = @transform_1, window_bounds = array<i64: 16, 40>}, {pipeline_mode = #tpu.pipeline_mode<synchronous>, transform_indices = @transform_2, window_bounds = array<i64: 16, 1>}, {pipeline_mode = #tpu.pipeline_mode<synchronous>, transform_indices = @transform_3, window_bounds = array<i64: 16, 1>}, {pipeline_mode = #tpu.pipeline_mode<synchronous>, transform_indices = @transform_4, window_bounds = array<i64: 16, 1>}, {pipeline_mode = #tpu.pipeline_mode<synchronous>, transform_indices = @transform_5, window_bounds = array<i64: 16, 16>}, {pipeline_mode = #tpu.pipeline_mode<synchronous>, transform_indices = @transform_6, window_bounds = array<i64: 32, 2>}, {pipeline_mode = #tpu.pipeline_mode<synchronous>, transform_indices = @transform_7, window_bounds = array<i64: 2, 32>}, {transform_indices = @transform_8, window_bounds = array<i64: 16, 32>}]} {
    %c0 = arith.constant 0 : index
    %c0_0 = arith.constant 0 : index
    %c0_1 = arith.constant 0 : index
    %0 = vector.load %arg1[%c0, %c0_0, %c0_1] : memref<2x8x20xf32, #tpu.memory_space<vmem>>, vector<2x8x20xf32>
    %1 = vector.extract_strided_slice %0 {offsets = [0, 0, 0], sizes = [1, 8, 16], strides = [1, 1, 1]} : vector<2x8x20xf32> to vector<1x8x16xf32>
    %2 = vector.shape_cast %1 : vector<1x8x16xf32> to vector<8x16xf32>
    %3 = vector.extract_strided_slice %0 {offsets = [1, 0, 0], sizes = [1, 8, 16], strides = [1, 1, 1]} : vector<2x8x20xf32> to vector<1x8x16xf32>
    %4 = vector.shape_cast %3 : vector<1x8x16xf32> to vector<8x16xf32>
    %5 = tpu.concatenate %2, %4 in 1 : vector<8x16xf32>, vector<8x16xf32> -> vector<8x32xf32>
    %6 = vector.extract_strided_slice %0 {offsets = [0, 0, 1], sizes = [1, 8, 16], strides = [1, 1, 1]} : vector<2x8x20xf32> to vector<1x8x16xf32>
    %7 = vector.shape_cast %6 : vector<1x8x16xf32> to vector<8x16xf32>
    %8 = vector.extract_strided_slice %0 {offsets = [1, 0, 1], sizes = [1, 8, 16], strides = [1, 1, 1]} : vector<2x8x20xf32> to vector<1x8x16xf32>
    %9 = vector.shape_cast %8 : vector<1x8x16xf32> to vector<8x16xf32>
    %10 = tpu.concatenate %7, %9 in 1 : vector<8x16xf32>, vector<8x16xf32> -> vector<8x32xf32>
    %11 = vector.extract_strided_slice %0 {offsets = [0, 0, 2], sizes = [1, 8, 16], strides = [1, 1, 1]} : vector<2x8x20xf32> to vector<1x8x16xf32>
    %12 = vector.shape_cast %11 : vector<1x8x16xf32> to vector<8x16xf32>
    %13 = vector.extract_strided_slice %0 {offsets = [1, 0, 2], sizes = [1, 8, 16], strides = [1, 1, 1]} : vector<2x8x20xf32> to vector<1x8x16xf32>
    %14 = vector.shape_cast %13 : vector<1x8x16xf32> to vector<8x16xf32>
    %15 = tpu.concatenate %12, %14 in 1 : vector<8x16xf32>, vector<8x16xf32> -> vector<8x32xf32>
    %16 = vector.extract_strided_slice %0 {offsets = [0, 0, 3], sizes = [1, 8, 16], strides = [1, 1, 1]} : vector<2x8x20xf32> to vector<1x8x16xf32>
    %17 = vector.shape_cast %16 : vector<1x8x16xf32> to vector<8x16xf32>
    %18 = vector.extract_strided_slice %0 {offsets = [1, 0, 3], sizes = [1, 8, 16], strides = [1, 1, 1]} : vector<2x8x20xf32> to vector<1x8x16xf32>
    %19 = vector.shape_cast %18 : vector<1x8x16xf32> to vector<8x16xf32>
    %20 = tpu.concatenate %17, %19 in 1 : vector<8x16xf32>, vector<8x16xf32> -> vector<8x32xf32>
    %21 = vector.extract_strided_slice %0 {offsets = [0, 0, 4], sizes = [1, 8, 16], strides = [1, 1, 1]} : vector<2x8x20xf32> to vector<1x8x16xf32>
    %22 = vector.shape_cast %21 : vector<1x8x16xf32> to vector<8x16xf32>
    %23 = vector.extract_strided_slice %0 {offsets = [1, 0, 4], sizes = [1, 8, 16], strides = [1, 1, 1]} : vector<2x8x20xf32> to vector<1x8x16xf32>
    %24 = vector.shape_cast %23 : vector<1x8x16xf32> to vector<8x16xf32>
    %25 = tpu.concatenate %22, %24 in 1 : vector<8x16xf32>, vector<8x16xf32> -> vector<8x32xf32>
    %26 = tpu.concatenate %5, %10, %15, %20, %25 in 0 : vector<8x32xf32>, vector<8x32xf32>, vector<8x32xf32>, vector<8x32xf32>, vector<8x32xf32> -> vector<40x32xf32>
    %c0_2 = arith.constant 0 : index
    %c0_3 = arith.constant 0 : index
    %27 = vector.load %arg2[%c0_2, %c0_3] : memref<16x40xf32, #tpu.memory_space<vmem>>, vector<16x40xf32>
    %cst = arith.constant dense<0.000000e+00> : vector<16x32xf32>
    %28 = tpu.matmul %27, %26, %cst {dimension_numbers = #tpu.dot_dimension_numbers<[1], [0], [0], [1], [0, 0, 1, 1], [], []>} : vector<16x40xf32>, vector<40x32xf32>, vector<16x32xf32> -> vector<16x32xf32>
    %c0_4 = arith.constant 0 : index
    %c0_5 = arith.constant 0 : index
    %29 = vector.load %arg3[%c0_4, %c0_5] : memref<16x1xf32, #tpu.memory_space<vmem>>, vector<16x1xf32>
    %30 = vector.broadcast %29 : vector<16x1xf32> to vector<16x32xf32>
    %31 = arith.addf %28, %30 : vector<16x32xf32>
    %cst_6 = arith.constant 0.000000e+00 : f32
    %32 = vector.broadcast %cst_6 : f32 to vector<16x32xf32>
    %33 = arith.maximumf %31, %32 : vector<16x32xf32>
    %c0_7 = arith.constant 0 : index
    %c0_8 = arith.constant 0 : index
    %34 = vector.load %arg7[%c0_7, %c0_8] : memref<32x2xf32, #tpu.memory_space<vmem>>, vector<32x2xf32>
    %cst_9 = arith.constant dense<0.000000e+00> : vector<16x2xf32>
    %35 = tpu.matmul %33, %34, %cst_9 {dimension_numbers = #tpu.dot_dimension_numbers<[1], [0], [0], [1], [0, 0, 1, 1], [], []>} : vector<16x32xf32>, vector<32x2xf32>, vector<16x2xf32> -> vector<16x2xf32>
    %36 = arith.mulf %33, %33 : vector<16x32xf32>
    %c0_10 = arith.constant 0 : index
    %c0_11 = arith.constant 0 : index
    %37 = vector.load %arg7[%c0_10, %c0_11] : memref<32x2xf32, #tpu.memory_space<vmem>>, vector<32x2xf32>
    %cst_12 = arith.constant dense<0.000000e+00> : vector<16x2xf32>
    %38 = tpu.matmul %36, %37, %cst_12 {dimension_numbers = #tpu.dot_dimension_numbers<[1], [0], [0], [1], [0, 0, 1, 1], [], []>} : vector<16x32xf32>, vector<32x2xf32>, vector<16x2xf32> -> vector<16x2xf32>
    %c0_13 = arith.constant 0 : index
    %c0_14 = arith.constant 0 : index
    %39 = vector.load %arg6[%c0_13, %c0_14] : memref<16x16xf32, #tpu.memory_space<vmem>>, vector<16x16xf32>
    %cst_15 = arith.constant dense<0.000000e+00> : vector<16x2xf32>
    %40 = tpu.matmul %39, %35, %cst_15 {dimension_numbers = #tpu.dot_dimension_numbers<[1], [0], [0], [1], [0, 0, 1, 1], [], []>} : vector<16x16xf32>, vector<16x2xf32>, vector<16x2xf32> -> vector<16x2xf32>
    %c0_16 = arith.constant 0 : index
    %c0_17 = arith.constant 0 : index
    %41 = vector.load %arg6[%c0_16, %c0_17] : memref<16x16xf32, #tpu.memory_space<vmem>>, vector<16x16xf32>
    %cst_18 = arith.constant dense<0.000000e+00> : vector<16x2xf32>
    %42 = tpu.matmul %41, %38, %cst_18 {dimension_numbers = #tpu.dot_dimension_numbers<[1], [0], [0], [1], [0, 0, 1, 1], [], []>} : vector<16x16xf32>, vector<16x2xf32>, vector<16x2xf32> -> vector<16x2xf32>
    %43 = arith.mulf %40, %40 : vector<16x2xf32>
    %44 = arith.subf %42, %43 : vector<16x2xf32>
    %cst_19 = arith.constant 0.000000e+00 : f32
    %45 = vector.broadcast %cst_19 : f32 to vector<16x2xf32>
    %46 = arith.maximumf %44, %45 : vector<16x2xf32>
    %cst_20 = arith.constant 9.99999974E-6 : f32
    %47 = vector.broadcast %cst_20 : f32 to vector<16x2xf32>
    %48 = arith.addf %46, %47 : vector<16x2xf32>
    %49 = math.rsqrt %48 : vector<16x2xf32>
    %c0_21 = arith.constant 0 : index
    %c0_22 = arith.constant 0 : index
    %50 = vector.load %arg4[%c0_21, %c0_22] : memref<16x1xf32, #tpu.memory_space<vmem>>, vector<16x1xf32>
    %51 = vector.broadcast %50 : vector<16x1xf32> to vector<16x2xf32>
    %52 = arith.mulf %51, %49 : vector<16x2xf32>
    %c0_23 = arith.constant 0 : index
    %c0_24 = arith.constant 0 : index
    %53 = vector.load %arg5[%c0_23, %c0_24] : memref<16x1xf32, #tpu.memory_space<vmem>>, vector<16x1xf32>
    %54 = arith.mulf %40, %52 : vector<16x2xf32>
    %55 = vector.broadcast %53 : vector<16x1xf32> to vector<16x2xf32>
    %56 = arith.subf %55, %54 : vector<16x2xf32>
    %c0_25 = arith.constant 0 : index
    %c0_26 = arith.constant 0 : index
    %57 = vector.load %arg8[%c0_25, %c0_26] : memref<2x32xf32, #tpu.memory_space<vmem>>, vector<2x32xf32>
    %cst_27 = arith.constant dense<0.000000e+00> : vector<16x32xf32>
    %58 = tpu.matmul %52, %57, %cst_27 {dimension_numbers = #tpu.dot_dimension_numbers<[1], [0], [0], [1], [0, 0, 1, 1], [], []>} : vector<16x2xf32>, vector<2x32xf32>, vector<16x32xf32> -> vector<16x32xf32>
    %c0_28 = arith.constant 0 : index
    %c0_29 = arith.constant 0 : index
    %59 = vector.load %arg8[%c0_28, %c0_29] : memref<2x32xf32, #tpu.memory_space<vmem>>, vector<2x32xf32>
    %cst_30 = arith.constant dense<0.000000e+00> : vector<16x32xf32>
    %60 = tpu.matmul %56, %59, %cst_30 {dimension_numbers = #tpu.dot_dimension_numbers<[1], [0], [0], [1], [0, 0, 1, 1], [], []>} : vector<16x2xf32>, vector<2x32xf32>, vector<16x32xf32> -> vector<16x32xf32>
    %61 = arith.mulf %33, %58 : vector<16x32xf32>
    %62 = arith.addf %61, %60 : vector<16x32xf32>
    %c0_31 = arith.constant 0 : index
    %c0_32 = arith.constant 0 : index
    %63 = vector.load %arg9[%c0_31, %c0_32] : memref<16x32xf32, #tpu.memory_space<vmem>>, vector<16x32xf32>
    tpu.vector_store %arg9[%c0_31, %c0_32], %62 {strides = array<i32>} : memref<16x32xf32, #tpu.memory_space<vmem>>, vector<16x32xf32>,
    return
  }
  func.func @transform_0(%arg0: i32) -> (i32, i32, i32) {
    %c0_i32 = arith.constant 0 : i32
    %c0_i32_0 = arith.constant 0 : i32
    %c0_i32_1 = arith.constant 0 : i32
    return %arg0, %c0_i32, %c0_i32_0 : i32, i32, i32
  }
  func.func @transform_1(%arg0: i32) -> (i32, i32) {
    %c0_i32 = arith.constant 0 : i32
    %c0_i32_0 = arith.constant 0 : i32
    %c0_i32_1 = arith.constant 0 : i32
    return %c0_i32, %c0_i32_0 : i32, i32
  }
  func.func @transform_2(%arg0: i32) -> (i32, i32) {
    %c0_i32 = arith.constant 0 : i32
    %c0_i32_0 = arith.constant 0 : i32
    %c0_i32_1 = arith.constant 0 : i32
    return %c0_i32, %c0_i32_0 : i32, i32
  }
  func.func @transform_3(%arg0: i32) -> (i32, i32) {
    %c0_i32 = arith.constant 0 : i32
    %c0_i32_0 = arith.constant 0 : i32
    %c0_i32_1 = arith.constant 0 : i32
    return %c0_i32, %c0_i32_0 : i32, i32
  }
  func.func @transform_4(%arg0: i32) -> (i32, i32) {
    %c0_i32 = arith.constant 0 : i32
    %c0_i32_0 = arith.constant 0 : i32
    %c0_i32_1 = arith.constant 0 : i32
    return %c0_i32, %c0_i32_0 : i32, i32
  }
  func.func @transform_5(%arg0: i32) -> (i32, i32) {
    %c0_i32 = arith.constant 0 : i32
    %c0_i32_0 = arith.constant 0 : i32
    %c0_i32_1 = arith.constant 0 : i32
    return %c0_i32, %c0_i32_0 : i32, i32
  }
  func.func @transform_6(%arg0: i32) -> (i32, i32) {
    %c0_i32 = arith.constant 0 : i32
    %c0_i32_0 = arith.constant 0 : i32
    %c0_i32_1 = arith.constant 0 : i32
    return %c0_i32, %c0_i32_0 : i32, i32
  }
  func.func @transform_7(%arg0: i32) -> (i32, i32) {
    %c0_i32 = arith.constant 0 : i32
    %c0_i32_0 = arith.constant 0 : i32
    %c0_i32_1 = arith.constant 0 : i32
    return %c0_i32, %c0_i32_0 : i32, i32
  }
  func.func @transform_8(%arg0: i32) -> (i32, i32) {
    %c0_i32 = arith.constant 0 : i32
    %c0_i32_0 = arith.constant 0 : i32
    return %c0_i32, %arg0 : i32, i32
  }
}

</mosaic_0001>

<bundles_post_ra>
// kernel: tpu_custom_call.1
= control target key start
LH: loop header
LB: loop body
LE: loop exit
PB: predicated region body
PF: predicated region fallthrough
CT: control target
= control target key end

     0   :  { %s905_s29 = smov 16   ;;  %s906_s30 = smov 15   ;;  %s1055_s0 = inlined_call_operand.vmem [shape: f32[2,8,20], index: 0, kind: input, shape index: {}]   ;;  %s1056_s1 = inlined_call_operand.vmem [shape: f32[16,40], index: 1, kind: input, shape index: {}]   ;;  %s1057_s2 = inlined_call_operand.vmem [shape: f32[16,1], index: 2, kind: input, shape index: {}]   ;;  %s1058_s3 = inlined_call_operand.vmem [shape: f32[16,1], index: 3, kind: input, shape index: {}]   ;;  %s1059_s4 = inlined_call_operand.vmem [shape: f32[16,1], index: 4, kind: input, shape index: {}]   ;;  %s1060_s5 = inlined_call_operand.vmem [shape: f32[16,16], index: 5, kind: input, shape index: {}]   ;;  %s1061_s6 = inlined_call_operand.vmem [shape: f32[32,2], index: 6, kind: input, shape index: {}]   ;;  %s1062_s7 = inlined_call_operand.vmem [shape: f32[2,32], index: 7, kind: input, shape index: {}]   ;;  %s1063_s8 = inlined_call_operand.hbm [shape: f32[16,32], index: 8, kind: output, shape index: {}]  }
   0x1   :  { %v31_v0 = vld [vmem:[%s1055_s0 + $0x8] sm:$0xff] }
   0x2   :  { %33 = vrot.lane.b32.xlu0 %v31_v0, %s905_s29  ;;  %42 = vrot.lane.b32.xlu1 %v31_v0, %s906_s30 }
   0x3   :  { %13 = vsyncpa [#allocation3], 0  ;;  %v30_v1 = vld [vmem:[%s1055_s0] sm:$0xff]  ;;  %s907_s11 = smov 127   ;;  %s908_s12 = smov 126   ;;  %vm81_vm0 = vcmask 326656  }
   0x4   :  { %v67_v2 = vld [vmem:[%s1056_s1] sm:$0xff]  ;;  %s909_s15 = smov 14   ;;  %s910_s16 = smov 125   ;;  %v911_v3 = vmov 0   ;;  %v70_v6 = vld [vmem:[%s1057_s2 + $0x8] sm:$0xff]  ;;  %vm36_vm1 = vcmask 130048  }
   0x5   :  { %781 = vmatprep.mubr.msk.f32.mxu0 %vm81_vm0, %v67_v2  ;;  %875 = vset.pattern.permute.xlu1 %v911_v3  ;;  %s912_s17 = smov 13   ;;  %s913_s0 = smov 124   ;;  %v69_v4 = vld [vmem:[%s1057_s2] sm:$0xff]  ;;  %v503_v7 = vld [vmem:[%s1058_s3 + $0x8] sm:$0xff]  ;;  %v167_v30 = vld [vmem:[%s1061_s6 + $0x10] sm:$0xff]  ;;  %vm169_vm2 = vcmask 261120  }
   0x6   :  { %39 = vrot.lane.b32.xlu0 %v30_v1, %s907_s11  ;;  %46 = vrot.lane.b32.xlu1 %v30_v1, %s908_s12  ;;  %s914_s20 = smov 12   ;;  %v502_v5 = vld [vmem:[%s1058_s3] sm:$0xff]  ;;  %v166_v10 = vld [vmem:[%s1061_s6 + $0x8] sm:$0xff]  ;;  %vm540_vm3 = vcmask 1041408   ;;  %vm533_vm4 = vcmask 15360  }
   0x7   :  { %876 = vset.pattern.permute.xlu0 %v911_v3  ;;  %v516_v8 = vld [vmem:[%s1059_s4] sm:$0xff]  ;;  %v517_v12 = vld [vmem:[%s1059_s4 + $0x8] sm:$0xff]  ;;  %v168_v31 = vld [vmem:[%s1061_s6 + $0x18] sm:$0xff] }
   0x8   :  { %v165_v9 = vld [vmem:[%s1061_s6] sm:$0xff]  ;;  %v68_v29 = vld [vmem:[%s1056_s1 + $0x8] sm:$0xff]  ;;  %v842_v32 = vpack.c.bf16 %v168_v31, %v167_v30 }
   0x9   :  { %v838_v11 = vpack.c.bf16 %v166_v10, %v165_v9  ;;  %v334_v43 = vld [vmem:[%s1060_s5] sm:$0xff]  ;;  %v335_v47 = vld [vmem:[%s1060_s5 + $0x8] sm:$0xff]  ;;  %s915_s5 = smov [#allocation2]  }
   0xa   :  { %49 = vrot.lane.b32.xlu0 %v31_v0, %s909_s15  ;;  %53 = vrot.lane.b32.xlu1 %v30_v1, %s910_s16  ;;  %v532_v51 = vld [vmem:[%s1062_s7] sm:$0x3]  ;;  %s711_s7 = sshll.u32 %s915_s5, 4  ;;  %s712_s7 = int_to_ptr.vmem [resolvable:$true] %s711_s7 }
   0xb   :  { %839 = vmatprep.subr.bf16.mxu1 %v838_v11  ;;  %s881_s19 = scalar_lea.vmem %s712_s7, 256  ;;  %p886_p1 = scmp.lt.s32.totalorder %s712_s7, %s712_s7 }
   0xc   :  { %841 = vmatpush3.bf16.msra.mxu1 %v838_v11  ;;  %p882_p0 = scmp.ne.s32.totalorder %s712_s7, %s881_s19  ;;  %p887_p2 = scmp.lt.s32.totalorder %s881_s19, %s881_s19 }
   0xd   :  { %843 = vmatprep.subr.bf16.mxu1 %v842_v32 }
   0xe   :  { %56 = vrot.lane.b32.xlu0 %v31_v0, %s912_s17  ;;  %60 = vrot.lane.b32.xlu1 %v30_v1, %s913_s0  ;;  %p888_p3 = por %p887_p2, %p886_p1 }
  0x10   :  { %845 = vmatpush3.bf16.msra.mxu1 %v842_v32  ;;  %p889_p4 = pnand %p888_p3, %p882_p0 }
  0x11   :  { %847 = vmatprep.subr.bf16.mxu1 %v838_v11 }
  0x12   :  { %63 = vrot.lane.b32.xlu0 %v31_v0, %s914_s20  ;;  %73 = vperm.xlu1 %875, %v69_v4  }
  0x16   :  { %506 = vperm.xlu1 %875, %v502_v5   ;;  %78 = vperm.xlu0 %876, %v70_v6  }
  0x1a   :  { %511 = vperm.xlu1 %875, %v503_v7   ;;  %522 = vperm.xlu0 %876, %v516_v8  }
  0x1e   :  { %527 = vperm.xlu1 %875, %v517_v12  }
  0x74   :  { %v34_v13 = vpop.permute.xlu0 %33  ;;  %v43_v14 = vpop.permute.xlu1 %42 }
  0x75   :  { %v37_v17 = vsel %vm36_vm1, %v30_v1, %v34_v13 }
  0x78   :  { %v40_v15 = vpop.permute.xlu0 %39  ;;  %v47_v16 = vpop.permute.xlu1 %46 }
  0x79   :  { %v45_v18 = vsel %vm36_vm1, %v40_v15, %v43_v14 }
  0x7a   :  { %v830_v19 = vpack.c.bf16 %v45_v18, %v37_v17 }
  0x7c   :  { %v50_v20 = vpop.permute.xlu0 %49  ;;  %831 = vmatprep.subr.bf16.mxu0 %v830_v19  ;;  %v54_v21 = vpop.permute.xlu1 %53 }
  0x7d   :  { %833 = vmatpush3.bf16.msra.mxu0 %v830_v19  ;;  %v52_v23 = vsel %vm36_vm1, %v47_v16, %v50_v20 }
  0x80   :  { %v57_v22 = vpop.permute.xlu0 %56  ;;  %v61_v26 = vpop.permute.xlu1 %60 }
  0x81   :  { %v59_v24 = vsel %vm36_vm1, %v54_v21, %v57_v22 }
  0x82   :  { %v834_v25 = vpack.c.bf16 %v59_v24, %v52_v23 }
  0x84   :  { %835 = vmatprep.subr.bf16.mxu0 %v834_v25  ;;  %v64_v27 = vpop.permute.xlu0 %63 }
  0x85   :  { %837 = vmatpush3.bf16.msra.mxu0 %v834_v25  ;;  %v66_v28 = vsel %vm36_vm1, %v61_v26, %v64_v27 }
  0x86   :  { %779 = vmatprep.subr.mxu0 %v66_v28 }
  0x89   :  { %780 = vmatpush3.msra.mxu0 %v66_v28 }
  0x8a   :  { %782 = vmatmul.mubr.msk.f32.vlgmr.msra.gmra.mrb[0].mxu0 %vm81_vm0, %v68_v29 }
  0x8b   :  { %810 = vmatprep.mubr.msk.f32.mxu0 %vm36_vm1, %v334_v43 }
  0x91   :  { %v74_v35 = vpop.permute.xlu1 %73 }
  0x95   :  { %v79_v33 = vpop.permute.xlu0 %78  ;;  %v507_v0 = vpop.permute.xlu1 %506 }
  0x99   :  { %v512_v2 = vpop.permute.xlu1 %511  ;;  %v523_v8 = vpop.permute.xlu0 %522 }
  0x9d   :  { %v528_v9 = vpop.permute.xlu1 %527 }
 0x15d   :  { %v783_v34 = vpop.f32.mrb[0].mxu0 }
 0x15e   :  { %v160_v36 = vadd.f32 %v783_v34, %v79_v33  ;;  %v154_v37 = vpop.f32.mrb[1].mxu0 }
 0x15f   :  { %v155_v38 = vadd.f32 %v154_v37, %v74_v35 }
 0x160   :  { %v1014_v40 = vmax.f32 %v160_v36, 0.0 }
 0x161   :  { %v1012_v39 = vmax.f32 %v155_v38, 0.0 }
 0x162   :  { %v252_v42 = vmul.f32 %v1014_v40, %v1014_v40 }
 0x163   :  { %v251_v41 = vmul.f32 %v1012_v39, %v1012_v39  ;;  %792 = vmatprep.mubr.msk.f32.mxu1 %vm169_vm2, %v1012_v39 }
 0x164   :  { %793 = vmatmul.mubr.msk.f32.vlgmr.msra.gmra.mrb[0].mxu1 %vm169_vm2, %v1014_v40 }
 0x165   :  { %849 = vmatpush3.bf16.msra.mxu1 %v838_v11  ;;  %803 = vmatprep.mubr.msk.f32.mxu1 %vm169_vm2, %v251_v41 }
 0x166   :  { %851 = vmatprep.subr.bf16.mxu1 %v842_v32 }
 0x169   :  { %853 = vmatpush3.bf16.msra.mxu1 %v842_v32 }
 0x16a   :  { %820 = vmatprep.subr.msk.mxu1 %vm540_vm3, %v532_v51 }
 0x16c   :  { %804 = vmatmul.mubr.msk.f32.vlgmr.msra.gmra.mrb[2].mxu1 %vm169_vm2, %v252_v42 }
 0x16d   :  { %821 = vmatpush3.msk.msra.mxu1 %vm540_vm3, %v532_v51 }
 0x237   :  { %v794_v44 = vpop.f32.mrb[0].mxu1 }
 0x238   :  { %v242_v45 = vpop.f32.mrb[1].mxu1 }
 0x239   :  { %v854_v46 = vpack.c.bf16 %v794_v44, %v242_v45 }
 0x23b   :  { %855 = vmatprep.subr.bf16.mxu0 %v854_v46 }
 0x23c   :  { %857 = vmatpush3.bf16.msra.mxu0 %v854_v46 }
 0x23f   :  { %v805_v48 = vpop.f32.mrb[2].mxu1  ;;  %811 = vmatmul.mubr.msk.f32.vlgmr.msra.gmra.mrb[2].mxu0 %vm36_vm1, %v335_v47 }
 0x240   :  { %v325_v49 = vpop.f32.mrb[3].mxu1  ;;  %817 = vmatprep.mubr.msk.f32.mxu0 %vm36_vm1, %v334_v43 }
 0x241   :  { %v858_v50 = vpack.c.bf16 %v805_v48, %v325_v49 }
 0x243   :  { %859 = vmatprep.subr.bf16.mxu0 %v858_v50 }
 0x244   :  { %861 = vmatpush3.bf16.msra.mxu0 %v858_v50 }
 0x245   :  { %825 = vmatprep.subr.msk.mxu0 %vm540_vm3, %v532_v51 }
 0x247   :  { %818 = vmatmul.mubr.msk.f32.vlgmr.msra.gmra.mrb[4].mxu0 %vm36_vm1, %v335_v47 }
 0x248   :  { %826 = vmatpush3.msk.msra.mxu0 %vm540_vm3, %v532_v51 }
 0x312   :  { %v812_v52 = vpop.f32.mrb[2].mxu0 }
 0x313   :  { %v408_v53 = vpop.f32.mrb[3].mxu0  ;;  %v493_v54 = vmul.f32 %v812_v52, %v812_v52 }
 0x314   :  { %v492_v55 = vmul.f32 %v408_v53, %v408_v53 }
 0x31a   :  { %v819_v56 = vpop.f32.mrb[4].mxu0 }
 0x31b   :  { %v495_v57 = vsub.f32 %v819_v56, %v493_v54  ;;  %v483_v58 = vpop.f32.mrb[5].mxu0 }
 0x31c   :  { %v494_v59 = vsub.f32 %v483_v58, %v492_v55 }
 0x31d   :  { %v497_v60 = vmax.f32 %v495_v57, 0.0 }
 0x31e   :  { %v496_v61 = vmax.f32 %v494_v59, 0.0 }
 0x31f   :  { %v499_v62 = vadd.f32 1e-05, %v497_v60 }
 0x320   :  { %v498_v63 = vadd.f32 1e-05, %v496_v61 }
 0x321   :  { %877 = vrsqrt.f32 %v499_v62 }
 0x322   :  { %879 = vrsqrt.f32 %v498_v63 }
 0x32b   :  { %v878_v1 = vpop.eup %877 }
 0x32c   :  { %v880_v3 = vpop.eup %879  ;;  %v515_v4 = vmul.f32 %v878_v1, %v512_v2 }
 0x32d   :  { %v514_v5 = vmul.f32 %v880_v3, %v507_v0 }
 0x32e   :  { %v519_v6 = vmul.f32 %v812_v52, %v515_v4 }
 0x32f   :  { %822 = vmatprep.mubr.msk.f32.mxu1 %vm533_vm4, %v514_v5  ;;  %v518_v7 = vmul.f32 %v514_v5, %v408_v53 }
 0x330   :  { %823 = vmatmul.mubr.msk.f32.vlgmr.msra.gmra.mrb[4].mxu1 %vm533_vm4, %v515_v4  ;;  %v531_v11 = vsub.f32 %v528_v9, %v519_v6 }
 0x331   :  { %v530_v10 = vsub.f32 %v523_v8, %v518_v7 }
 0x333   :  { %827 = vmatprep.mubr.msk.f32.mxu0 %vm533_vm4, %v530_v10 }
 0x334   :  { %828 = vmatmul.mubr.msk.f32.vlgmr.msra.gmra.mrb[6].mxu0 %vm533_vm4, %v531_v11 }
 0x403   :  { %v824_v12 = vpop.f32.mrb[4].mxu1 }
 0x404   :  { %v610_v13 = vpop.f32.mrb[5].mxu1  ;;  %v701_v14 = vmul.f32 %v824_v12, %v1014_v40 }
 0x405   :  { %v700_v15 = vmul.f32 %v610_v13, %v1012_v39 }
 0x407   :  { %v829_v16 = vpop.f32.mrb[6].mxu0 }
 0x408   :  { %v703_v17 = vadd.f32 %v829_v16, %v701_v14  ;;  %v691_v18 = vpop.f32.mrb[7].mxu0 }
 0x409   :  { %v702_v19 = vadd.f32 %v700_v15, %v691_v18 }
 0x40a   :  { %705 = vst.msk [vmem:[#allocation2 + $0x8] sm:$0xff] %vm169_vm2, %v703_v17 }
 0x40b   :  { %704 = vst.msk [vmem:[#allocation2] sm:$0xff] %vm169_vm2, %v702_v19 }
 0x40c   :  { %892 = shalt.err (!%p889_p4)
}
 0x40d   :  { %s893_s22 = scalar_lea.hbm %s1063_s8, 256 }
 0x40e   :  { %p894_p5 = scmp.ne.s32.totalorder %s1063_s8, %s893_s22  ;;  %p897_p6 = scmp.lt.u32.totalorder %s893_s22, %s1063_s8 }
 0x410   :  { %p899_p7 = pnand %p897_p6, %p894_p5 }
 0x412   :  { %902 = shalt.err (!%p899_p7)
}
 0x413   :  { %s916_s27 = smov 128   ;;  %s917_s28 = smov 8  }
 0x414   :  { %717 = dma.vmem_to_hbm [thread:$0]  %s712_s7, 256, %s1063_s8, [#allocation3], %s916_s27, %s916_s27, %s917_s28  }
 0x415   :  { %903 = dma.done.wait [#allocation3], 256  }
 0x416   :  { %904 = vsyncadd [#allocation3], 4294967040 }
 0x417   :  { %721 = vsyncpa [#allocation3], 1 }

</bundles_post_ra>
